<compile_context>
chip_gen: v7x
topology: tpu7x:2x2x1
jax: 0.10.0
libtpu: 0.0.40
codegen_flags: <defaults>
</compile_context>

<pallas_src>
import math

import numpy as np
import jax
import jax.numpy as jnp
from jax import lax
from jax.experimental import pallas as pl
from jax.experimental.pallas import tpu as pltpu

# Module-consistent small sizes (embed_dim divisible by n_heads=3).
EMBED_DIM = 24
N_HEADS = 3
HEAD_DIM = EMBED_DIM // N_HEADS      # 8
SEQ = 8
BATCH = 2
BS = BATCH * SEQ                     # 16 flattened (batch*seq) rows
STK = N_HEADS * BS                   # 48 head-stacked rows
LANE = 128                           # lane-dense tile / output slab width


def _mha_kernel(q_ref, k_ref, v_ref, wq_ref, wk_ref, wvo_ref, mask_ref, bo_ref, out_ref):
    # q/k/v refs : (BS, E)       flattened activations
    # wq/wk refs : (E, H*128)    per-head blocks at lane 0 of their own 128-lane tile
    #                            (wq pre-scaled by 1/sqrt(Dh))
    # wvo_ref    : (E, H*128)    per-head (Wv^T @ Wo_h^T), zero-padded to 128 lanes
    # mask_ref   : (STK, STK)    additive block-diagonal softmax mask (0 / -1e30)
    # bo_ref     : (1, 128)      output bias, zero-padded lanes
    # out_ref    : (BS, 128)     lane-dense output slab
    qp = jnp.dot(q_ref[...], wq_ref[...], preferred_element_type=jnp.float32)   # (BS, H*128)
    kp = jnp.dot(k_ref[...], wk_ref[...], preferred_element_type=jnp.float32)   # (BS, H*128)
    vp = jnp.dot(v_ref[...], wvo_ref[...], preferred_element_type=jnp.float32)  # (BS, H*128)

    # Stack heads along sublanes; every source slice starts at lane 0 of its tile.
    q_stk = jnp.concatenate(
        [qp[:, h * LANE:h * LANE + HEAD_DIM] for h in range(N_HEADS)], axis=0)   # (STK, Dh)
    k_stk = jnp.concatenate(
        [kp[:, h * LANE:h * LANE + HEAD_DIM] for h in range(N_HEADS)], axis=0)   # (STK, Dh)
    vw_stk = jnp.concatenate(
        [vp[:, h * LANE:(h + 1) * LANE] for h in range(N_HEADS)], axis=0)        # (STK, 128)

    # One matmul covers all (head, batch) logit blocks; 1/sqrt(Dh) already in Wq.
    # Contract dim 1 with dim 1 -> no explicit transpose of K.
    logits = lax.dot_general(q_stk, k_stk, (((1,), (1,)), ((), ())),
                             preferred_element_type=jnp.float32)                 # (STK, STK)
    logits = logits + mask_ref[...]          # block-diagonal mask keeps heads/batches separate

    # Single batched softmax over all 6 attention blocks.
    logits = logits - jnp.max(logits, axis=-1, keepdims=True)
    p = jnp.exp(logits)
    denom = jnp.sum(p, axis=-1, keepdims=True)
    r = pl.reciprocal(denom, approx=True)    # EUP vrcp (off the VALU path)
    r = r * (2.0 - denom * r)                # one Newton step -> ~f32 accuracy
    p = p * r

    # Attention and output projection in one MXU call (Wo folded into V weight).
    ow = jnp.dot(p, vw_stk, preferred_element_type=jnp.float32)                  # (STK, 128)

    # Reduce head row-blocks, add bias, single lane-dense store.
    out_ref[...] = (ow[0:BS, :] + ow[BS:2 * BS, :] + ow[2 * BS:3 * BS, :]) + bo_ref[...]


def _prepare_params(wq, wk, wv, wo, bo):
    """One-time weight preparation (numpy, outside the per-call path)."""
    wq = np.asarray(wq, np.float32)
    wk = np.asarray(wk, np.float32)
    wv = np.asarray(wv, np.float32)
    wo = np.asarray(wo, np.float32)
    bo = np.asarray(bo, np.float32)

    scale = 1.0 / math.sqrt(HEAD_DIM)
    wo_t = wo.T                                                   # (E, E)

    wq_wide = np.zeros((EMBED_DIM, N_HEADS * LANE), np.float32)
    wk_wide = np.zeros_like(wq_wide)
    wvo_wide = np.zeros_like(wq_wide)
    for h in range(N_HEADS):
        r0 = h * HEAD_DIM
        c0 = h * LANE
        wq_wide[r0:r0 + HEAD_DIM, c0:c0 + HEAD_DIM] = wq.T * scale
        wk_wide[r0:r0 + HEAD_DIM, c0:c0 + HEAD_DIM] = wk.T
        # Fold per-head output projection into the value projection:
        # (x_vh @ Wv^T) @ Wo_h^T == x_vh @ (Wv^T @ Wo_h^T)
        wvo_wide[r0:r0 + HEAD_DIM, c0:c0 + EMBED_DIM] = wv.T @ wo_t[r0:r0 + HEAD_DIM, :]

    # Additive block-diagonal mask over the head-stacked rows: row = h*BS + b*SEQ + s,
    # so 8-row blocks along the diagonal are exactly the (head, batch) attention blocks.
    blk = np.arange(STK) // SEQ
    mask = np.where(blk[:, None] == blk[None, :], 0.0, -1e30).astype(np.float32)

    bo_pad = np.zeros((1, LANE), np.float32)
    bo_pad[0, :EMBED_DIM] = bo

    return (jnp.asarray(wq_wide), jnp.asarray(wk_wide), jnp.asarray(wvo_wide),
            jnp.asarray(mask), jnp.asarray(bo_pad))


def make_multihead_attention(wq, wk, wv, wo, bo):
    """Returns a jitted forward fn closing over the pre-prepared weights."""
    wq_wide, wk_wide, wvo_wide, mask, bo_pad = _prepare_params(wq, wk, wv, wo, bo)

    vmem_specs = [pl.BlockSpec(memory_space=pltpu.MemorySpace.VMEM) for _ in range(8)]
    kernel = pl.pallas_call(
        _mha_kernel,
        out_shape=jax.ShapeDtypeStruct((BS, LANE), jnp.float32),
        in_specs=vmem_specs,
        out_specs=pl.BlockSpec(memory_space=pltpu.MemorySpace.VMEM),
    )

    @jax.jit
    def mha(key_vec, query_vec, value_vec):
        B, S, E = key_vec.shape
        q2 = query_vec.reshape(B * S, E)     # contiguous, free reshapes
        k2 = key_vec.reshape(B * S, E)
        v2 = value_vec.reshape(B * S, E)
        out = kernel(q2, k2, v2, wq_wide, wk_wide, wvo_wide, mask, bo_pad)
        # Padded lane-dense slab -> (B, S, E); fuses inside this jitted program.
        return out[:, :E].reshape(B, S, E)

    return mha


def mha_reference(key_vec, query_vec, value_vec, wq, wk, wv, wo, bo):
    """Plain-JAX reference mirroring the PyTorch forward exactly."""
    B, S, E = key_vec.shape

    def split(x):
        return x.reshape(B, S, N_HEADS, HEAD_DIM)

    k = split(key_vec) @ wk.T
    q = split(query_vec) @ wq.T
    v = split(value_vec) @ wv.T
    q = q.transpose(0, 2, 1, 3)
    k = k.transpose(0, 2, 1, 3)
    v = v.transpose(0, 2, 1, 3)
    logits = (q @ k.transpose(0, 1, 3, 2)) / math.sqrt(HEAD_DIM)
    probs = jax.nn.softmax(logits, axis=-1)
    o = probs @ v
    concat = o.transpose(0, 2, 1, 3).reshape(B, S, E)
    return concat @ wo.T + bo


if __name__ == "__main__":
    root = jax.random.PRNGKey(0)
    k_key, k_query, k_value, k_wq, k_wk, k_wv, k_wo, k_bo = jax.random.split(root, 8)

    # Deterministic synthetic parameters (nn.Linear shapes: weight = (out, in)).
    bound_h = 1.0 / math.sqrt(HEAD_DIM)
    bound_e = 1.0 / math.sqrt(EMBED_DIM)
    wq = jax.random.uniform(k_wq, (HEAD_DIM, HEAD_DIM), jnp.float32, -bound_h, bound_h)
    wk = jax.random.uniform(k_wk, (HEAD_DIM, HEAD_DIM), jnp.float32, -bound_h, bound_h)
    wv = jax.random.uniform(k_wv, (HEAD_DIM, HEAD_DIM), jnp.float32, -bound_h, bound_h)
    wo = jax.random.uniform(k_wo, (EMBED_DIM, EMBED_DIM), jnp.float32, -bound_e, bound_e)
    bo = jax.random.uniform(k_bo, (EMBED_DIM,), jnp.float32, -bound_e, bound_e)

    key_vec = jax.random.normal(k_key, (BATCH, SEQ, EMBED_DIM), jnp.float32)
    query_vec = jax.random.normal(k_query, (BATCH, SEQ, EMBED_DIM), jnp.float32)
    value_vec = jax.random.normal(k_value, (BATCH, SEQ, EMBED_DIM), jnp.float32)

    mha = make_multihead_attention(wq, wk, wv, wo, bo)
    out = mha(key_vec, query_vec, value_vec)
    out = jax.block_until_ready(out)

    ref = mha_reference(key_vec, query_vec, value_vec, wq, wk, wv, wo, bo)
    assert out.shape == (BATCH, SEQ, EMBED_DIM)
    # Tightened tolerance (approx-reciprocal + Newton and the Wv.Wo fold are ~f32-accurate).
    assert jnp.allclose(out, ref, atol=2e-5, rtol=2e-5), "Pallas output mismatch vs reference"

    print("KERNEL_OK")
</pallas_src>

<mosaic_0001>
module attributes {stable_mosaic.version = 11 : i64} {
  func.func @_mha_kernel(%arg0: memref<16x24xf32, #tpu.memory_space<vmem>>, %arg1: memref<16x24xf32, #tpu.memory_space<vmem>>, %arg2: memref<16x24xf32, #tpu.memory_space<vmem>>, %arg3: memref<24x384xf32, #tpu.memory_space<vmem>>, %arg4: memref<24x384xf32, #tpu.memory_space<vmem>>, %arg5: memref<24x384xf32, #tpu.memory_space<vmem>>, %arg6: memref<48x48xf32, #tpu.memory_space<vmem>>, %arg7: memref<1x128xf32, #tpu.memory_space<vmem>>, %arg8: memref<16x128xf32, #tpu.memory_space<vmem>>) attributes {dimension_semantics = [], scalar_prefetch = 0 : i64, scratch_operands = 0 : i64, tpu.core_type = #tpu.core_type<tc>} {
    %c0 = arith.constant 0 : index
    %c0_0 = arith.constant 0 : index
    %0 = vector.load %arg0[%c0, %c0_0] : memref<16x24xf32, #tpu.memory_space<vmem>>, vector<16x24xf32>
    %c0_1 = arith.constant 0 : index
    %c0_2 = arith.constant 0 : index
    %1 = vector.load %arg3[%c0_1, %c0_2] : memref<24x384xf32, #tpu.memory_space<vmem>>, vector<24x384xf32>
    %cst = arith.constant dense<0.000000e+00> : vector<16x384xf32>
    %2 = tpu.matmul %0, %1, %cst {dimension_numbers = #tpu.dot_dimension_numbers<[1], [0], [0], [1], [0, 0, 1, 1], [], []>} : vector<16x24xf32>, vector<24x384xf32>, vector<16x384xf32> -> vector<16x384xf32>
    %c0_3 = arith.constant 0 : index
    %c0_4 = arith.constant 0 : index
    %3 = vector.load %arg1[%c0_3, %c0_4] : memref<16x24xf32, #tpu.memory_space<vmem>>, vector<16x24xf32>
    %c0_5 = arith.constant 0 : index
    %c0_6 = arith.constant 0 : index
    %4 = vector.load %arg4[%c0_5, %c0_6] : memref<24x384xf32, #tpu.memory_space<vmem>>, vector<24x384xf32>
    %cst_7 = arith.constant dense<0.000000e+00> : vector<16x384xf32>
    %5 = tpu.matmul %3, %4, %cst_7 {dimension_numbers = #tpu.dot_dimension_numbers<[1], [0], [0], [1], [0, 0, 1, 1], [], []>} : vector<16x24xf32>, vector<24x384xf32>, vector<16x384xf32> -> vector<16x384xf32>
    %c0_8 = arith.constant 0 : index
    %c0_9 = arith.constant 0 : index
    %6 = vector.load %arg2[%c0_8, %c0_9] : memref<16x24xf32, #tpu.memory_space<vmem>>, vector<16x24xf32>
    %c0_10 = arith.constant 0 : index
    %c0_11 = arith.constant 0 : index
    %7 = vector.load %arg5[%c0_10, %c0_11] : memref<24x384xf32, #tpu.memory_space<vmem>>, vector<24x384xf32>
    %cst_12 = arith.constant dense<0.000000e+00> : vector<16x384xf32>
    %8 = tpu.matmul %6, %7, %cst_12 {dimension_numbers = #tpu.dot_dimension_numbers<[1], [0], [0], [1], [0, 0, 1, 1], [], []>} : vector<16x24xf32>, vector<24x384xf32>, vector<16x384xf32> -> vector<16x384xf32>
    %9 = vector.extract_strided_slice %2 {offsets = [0, 0], sizes = [16, 8], strides = [1, 1]} : vector<16x384xf32> to vector<16x8xf32>
    %10 = vector.extract_strided_slice %2 {offsets = [0, 128], sizes = [16, 8], strides = [1, 1]} : vector<16x384xf32> to vector<16x8xf32>
    %11 = vector.extract_strided_slice %2 {offsets = [0, 256], sizes = [16, 8], strides = [1, 1]} : vector<16x384xf32> to vector<16x8xf32>
    %12 = tpu.concatenate %9, %10, %11 in 0 : vector<16x8xf32>, vector<16x8xf32>, vector<16x8xf32> -> vector<48x8xf32>
    %13 = vector.extract_strided_slice %5 {offsets = [0, 0], sizes = [16, 8], strides = [1, 1]} : vector<16x384xf32> to vector<16x8xf32>
    %14 = vector.extract_strided_slice %5 {offsets = [0, 128], sizes = [16, 8], strides = [1, 1]} : vector<16x384xf32> to vector<16x8xf32>
    %15 = vector.extract_strided_slice %5 {offsets = [0, 256], sizes = [16, 8], strides = [1, 1]} : vector<16x384xf32> to vector<16x8xf32>
    %16 = tpu.concatenate %13, %14, %15 in 0 : vector<16x8xf32>, vector<16x8xf32>, vector<16x8xf32> -> vector<48x8xf32>
    %17 = vector.extract_strided_slice %8 {offsets = [0, 0], sizes = [16, 128], strides = [1, 1]} : vector<16x384xf32> to vector<16x128xf32>
    %18 = vector.extract_strided_slice %8 {offsets = [0, 128], sizes = [16, 128], strides = [1, 1]} : vector<16x384xf32> to vector<16x128xf32>
    %19 = vector.extract_strided_slice %8 {offsets = [0, 256], sizes = [16, 128], strides = [1, 1]} : vector<16x384xf32> to vector<16x128xf32>
    %20 = tpu.concatenate %17, %18, %19 in 0 : vector<16x128xf32>, vector<16x128xf32>, vector<16x128xf32> -> vector<48x128xf32>
    %cst_13 = arith.constant dense<0.000000e+00> : vector<48x48xf32>
    %21 = tpu.matmul %12, %16, %cst_13 {dimension_numbers = #tpu.dot_dimension_numbers<[1], [1], [0], [0], [0, 0, 1, 0], [], []>} : vector<48x8xf32>, vector<48x8xf32>, vector<48x48xf32> -> vector<48x48xf32>
    %c0_14 = arith.constant 0 : index
    %c0_15 = arith.constant 0 : index
    %22 = vector.load %arg6[%c0_14, %c0_15] : memref<48x48xf32, #tpu.memory_space<vmem>>, vector<48x48xf32>
    %23 = arith.addf %21, %22 : vector<48x48xf32>
    %cst_16 = arith.constant dense<0xFF800000> : vector<48xf32>
    %24 = vector.multi_reduction <maximumf>, %23, %cst_16 [1] : vector<48x48xf32> to vector<48xf32>
    %25 = vector.shape_cast %24 : vector<48xf32> to vector<48x1xf32>
    %26 = vector.broadcast %25 : vector<48x1xf32> to vector<48x48xf32>
    %27 = arith.subf %23, %26 : vector<48x48xf32>
    %28 = math.exp %27 : vector<48x48xf32>
    %cst_17 = arith.constant dense<0.000000e+00> : vector<48xf32>
    %29 = vector.multi_reduction <add>, %28, %cst_17 [1] : vector<48x48xf32> to vector<48xf32>
    %30 = vector.shape_cast %29 : vector<48xf32> to vector<48x1xf32>
    %31 = tpu.reciprocal %30 {approx = true} : vector<48x1xf32> -> vector<48x1xf32>
    %32 = arith.mulf %30, %31 : vector<48x1xf32>
    %cst_18 = arith.constant 2.000000e+00 : f32
    %33 = vector.broadcast %cst_18 : f32 to vector<48x1xf32>
    %34 = arith.subf %33, %32 : vector<48x1xf32>
    %35 = arith.mulf %31, %34 : vector<48x1xf32>
    %36 = vector.broadcast %35 : vector<48x1xf32> to vector<48x48xf32>
    %37 = arith.mulf %28, %36 : vector<48x48xf32>
    %cst_19 = arith.constant dense<0.000000e+00> : vector<48x128xf32>
    %38 = tpu.matmul %37, %20, %cst_19 {dimension_numbers = #tpu.dot_dimension_numbers<[1], [0], [0], [1], [0, 0, 1, 1], [], []>} : vector<48x48xf32>, vector<48x128xf32>, vector<48x128xf32> -> vector<48x128xf32>
    %39 = vector.extract_strided_slice %38 {offsets = [0, 0], sizes = [16, 128], strides = [1, 1]} : vector<48x128xf32> to vector<16x128xf32>
    %40 = vector.extract_strided_slice %38 {offsets = [16, 0], sizes = [16, 128], strides = [1, 1]} : vector<48x128xf32> to vector<16x128xf32>
    %41 = arith.addf %39, %40 : vector<16x128xf32>
    %42 = vector.extract_strided_slice %38 {offsets = [32, 0], sizes = [16, 128], strides = [1, 1]} : vector<48x128xf32> to vector<16x128xf32>
    %43 = arith.addf %41, %42 : vector<16x128xf32>
    %c0_20 = arith.constant 0 : index
    %c0_21 = arith.constant 0 : index
    %44 = vector.load %arg7[%c0_20, %c0_21] : memref<1x128xf32, #tpu.memory_space<vmem>>, vector<1x128xf32>
    %45 = vector.broadcast %44 : vector<1x128xf32> to vector<16x128xf32>
    %46 = arith.addf %43, %45 : vector<16x128xf32>
    %c0_22 = arith.constant 0 : index
    %c0_23 = arith.constant 0 : index
    %47 = vector.load %arg8[%c0_22, %c0_23] : memref<16x128xf32, #tpu.memory_space<vmem>>, vector<16x128xf32>
    tpu.vector_store %arg8[%c0_22, %c0_23], %46 {strides = array<i32>} : memref<16x128xf32, #tpu.memory_space<vmem>>, vector<16x128xf32>,
    return
  }
}

</mosaic_0001>

<bundles_post_ra>
// kernel: mha.1
= control target key start
LH: loop header
LB: loop body
LE: loop exit
PB: predicated region body
PF: predicated region fallthrough
CT: control target
= control target key end

     0   :  { %13 = vsyncpa [#allocation3], 0  ;;  %s1571_s0 = inlined_call_operand.hbm [shape: f32[16,24], index: 0, kind: input, shape index: {}]   ;;  %s1572_s1 = inlined_call_operand.hbm [shape: f32[16,24], index: 1, kind: input, shape index: {}]   ;;  %s1573_s2 = inlined_call_operand.vmem [shape: f32[16,24], index: 2, kind: input, shape index: {}]   ;;  %s1574_s3 = inlined_call_operand.hbm [shape: f32[24,384], index: 3, kind: input, shape index: {}]   ;;  %s1575_s4 = inlined_call_operand.hbm [shape: f32[24,384], index: 4, kind: input, shape index: {}]   ;;  %s1576_s5 = inlined_call_operand.hbm [shape: f32[24,384], index: 5, kind: input, shape index: {}]   ;;  %s1577_s6 = inlined_call_operand.hbm [shape: f32[48,48], index: 6, kind: input, shape index: {}]   ;;  %s1578_s7 = inlined_call_operand.vmem [shape: f32[1,128], index: 7, kind: input, shape index: {}]   ;;  %s1579_s8 = inlined_call_operand.vmem [shape: f32[16,128], index: 8, kind: output, shape index: {}]  }
   0x1   :  { %14 = vsyncpa [#allocation5], 0 }
   0x2   :  { %15 = vsyncpa [#allocation8], 0 }
   0x3   :  { %16 = vsyncpa [#allocation11], 0  ;;  %s1350_s27 = smov [#allocation4]   ;;  %s1210_s9 = scalar_lea.hbm %s1572_s1, 256 }
   0x4   :  { %s34_s28 = sshll.u32 %s1350_s27, 4  ;;  %p1211_p0 = scmp.ne.s32.totalorder %s1572_s1, %s1210_s9  ;;  %s35_s28 = int_to_ptr.vmem [resolvable:$true] %s34_s28 }
   0x5   :  { %p1214_p1 = scmp.lt.u32.totalorder %s1210_s9, %s1572_s1 }
   0x7   :  { %p1216_p2 = pnand %p1214_p1, %p1211_p0 }
   0x9   :  { %1219 = shalt.err (!%p1216_p2)
}
   0xa   :  { %s1220_s14 = scalar_lea.vmem %s35_s28, 256  ;;  %p1225_p4 = scmp.lt.s32.totalorder %s35_s28, %s35_s28 }
   0xb   :  { %p1221_p3 = scmp.ne.s32.totalorder %s35_s28, %s1220_s14  ;;  %p1226_p5 = scmp.lt.s32.totalorder %s1220_s14, %s1220_s14 }
   0xd   :  { %p1227_p6 = por %p1226_p5, %p1225_p4 }
   0xf   :  { %p1228_p7 = pnand %p1227_p6, %p1221_p3 }
  0x11   :  { %1231 = shalt.err (!%p1228_p7)
}
  0x12   :  { %s1351_s15 = smov 128   ;;  %s1352_s16 = smov 8  }
  0x13   :  { %40 = dma.hbm_to_vmem [thread:$0]  %s1572_s1, 256, %s35_s28, [#allocation5], %s1351_s15, %s1351_s15, %s1352_s16  }
  0x14   :  { %s1353_s19 = smov [#allocation7]   ;;  %s1354_s21 = smov [#allocation2]  }
  0x15   :  { %s60_s20 = sshll.u32 %s1353_s19, 4  ;;  %s22_s22 = sshll.u32 %s1354_s21, 4  ;;  %s61_s20 = int_to_ptr.vmem [resolvable:$true] %s60_s20  ;;  %s23_s22 = int_to_ptr.vmem [resolvable:$true] %s22_s22 }
  0x16   :  { %s1232_s25 = scalar_lea.hbm %s1575_s4, 1152 }
  0x17   :  { %p1233_p8 = scmp.ne.s32.totalorder %s1575_s4, %s1232_s25  ;;  %p1236_p9 = scmp.lt.u32.totalorder %s1232_s25, %s1575_s4 }
  0x19   :  { %p1238_p10 = pnand %p1236_p9, %p1233_p8 }
  0x1b   :  { %1241 = shalt.err (!%p1238_p10)
}
  0x1c   :  { %s1242_s1 = scalar_lea.vmem %s61_s20, 1152  ;;  %p1247_p12 = scmp.lt.s32.totalorder %s61_s20, %s61_s20 }
  0x1d   :  { %p1243_p11 = scmp.ne.s32.totalorder %s61_s20, %s1242_s1  ;;  %p1248_p13 = scmp.lt.s32.totalorder %s1242_s1, %s1242_s1 }
  0x1f   :  { %p1249_p0 = por %p1248_p13, %p1247_p12 }
  0x21   :  { %p1250_p1 = pnand %p1249_p0, %p1243_p11 }
  0x23   :  { %1253 = shalt.err (!%p1250_p1)
}
  0x24   :  { %s1355_s28 = smov 384   ;;  %s1356_s9 = smov 24  }
  0x25   :  { %66 = dma.hbm_to_vmem [thread:$0]  %s1575_s4, 1152, %s61_s20, [#allocation8], %s1355_s28, %s1355_s28, %s1356_s9  }
  0x26   :  { %s1254_s14 = scalar_lea.hbm %s1571_s0, 256 }
  0x27   :  { %p1255_p2 = scmp.ne.s32.totalorder %s1571_s0, %s1254_s14  ;;  %p1258_p3 = scmp.lt.u32.totalorder %s1254_s14, %s1571_s0 }
  0x29   :  { %p1260_p4 = pnand %p1258_p3, %p1255_p2 }
  0x2b   :  { %1263 = shalt.err (!%p1260_p4)
}
  0x2c   :  { %s1264_s23 = scalar_lea.vmem %s23_s22, 256  ;;  %p1269_p6 = scmp.lt.s32.totalorder %s23_s22, %s23_s22 }
  0x2d   :  { %p1265_p5 = scmp.ne.s32.totalorder %s23_s22, %s1264_s23  ;;  %p1270_p7 = scmp.lt.s32.totalorder %s1264_s23, %s1264_s23 }
  0x2f   :  { %p1271_p8 = por %p1270_p7, %p1269_p6 }
  0x31   :  { %p1272_p9 = pnand %p1271_p8, %p1265_p5 }
  0x33   :  { %1275 = shalt.err (!%p1272_p9)
}
  0x34   :  { %28 = dma.hbm_to_vmem [thread:$0]  %s1571_s0, 256, %s23_s22, [#allocation3], %s1351_s15, %s1351_s15, %s1352_s16  }
  0x35   :  { %s1357_s24 = smov [#allocation6]   ;;  %s1358_s26 = smov [#allocation9]  }
  0x36   :  { %s48_s25 = sshll.u32 %s1357_s24, 4  ;;  %s72_s27 = sshll.u32 %s1358_s26, 4  ;;  %s49_s25 = int_to_ptr.vmem [resolvable:$true] %s48_s25  ;;  %s73_s27 = int_to_ptr.vmem [resolvable:$true] %s72_s27 }
  0x37   :  { %s1276_s1 = scalar_lea.hbm %s1574_s3, 1152 }
  0x38   :  { %p1277_p10 = scmp.ne.s32.totalorder %s1574_s3, %s1276_s1  ;;  %p1280_p11 = scmp.lt.u32.totalorder %s1276_s1, %s1574_s3 }
  0x3a   :  { %p1282_p12 = pnand %p1280_p11, %p1277_p10 }
  0x3c   :  { %1285 = shalt.err (!%p1282_p12)
}
  0x3d   :  { %s1286_s0 = scalar_lea.vmem %s49_s25, 1152  ;;  %p1291_p0 = scmp.lt.s32.totalorder %s49_s25, %s49_s25 }
  0x3e   :  { %p1287_p13 = scmp.ne.s32.totalorder %s49_s25, %s1286_s0  ;;  %p1292_p1 = scmp.lt.s32.totalorder %s1286_s0, %s1286_s0 }
  0x40   :  { %p1293_p2 = por %p1292_p1, %p1291_p0 }
  0x42   :  { %p1294_p3 = pnand %p1293_p2, %p1287_p13 }
  0x44   :  { %1297 = shalt.err (!%p1294_p3)
}
  0x45   :  { %54 = dma.hbm_to_vmem [thread:$0]  %s1574_s3, 1152, %s49_s25, [#allocation5], %s1355_s28, %s1355_s28, %s1356_s9  }
  0x46   :  { %s1298_s19 = scalar_lea.hbm %s1576_s5, 1152 }
  0x47   :  { %p1299_p4 = scmp.ne.s32.totalorder %s1576_s5, %s1298_s19  ;;  %p1302_p5 = scmp.lt.u32.totalorder %s1298_s19, %s1576_s5 }
  0x49   :  { %p1304_p6 = pnand %p1302_p5, %p1299_p4 }
  0x4b   :  { %1307 = shalt.err (!%p1304_p6)
}
  0x4c   :  { %s1308_s24 = scalar_lea.vmem %s73_s27, 1152  ;;  %p1313_p8 = scmp.lt.s32.totalorder %s73_s27, %s73_s27 }
  0x4d   :  { %p1309_p7 = scmp.ne.s32.totalorder %s73_s27, %s1308_s24  ;;  %p1314_p9 = scmp.lt.s32.totalorder %s1308_s24, %s1308_s24 }
  0x4f   :  { %p1315_p10 = por %p1314_p9, %p1313_p8 }
  0x51   :  { %p1316_p11 = pnand %p1315_p10, %p1309_p7 }
  0x53   :  { %1319 = shalt.err (!%p1316_p11)
}
  0x54   :  { %78 = dma.hbm_to_vmem [thread:$0]  %s1576_s5, 1152, %s73_s27, [#allocation8], %s1355_s28, %s1355_s28, %s1356_s9  }
  0x55   :  { %s1359_s26 = smov [#allocation10]   ;;  %s1320_s10 = scalar_lea.hbm %s1577_s6, 768 }
  0x56   :  { %s84_s29 = sshll.u32 %s1359_s26, 4  ;;  %p1321_p12 = scmp.ne.s32.totalorder %s1577_s6, %s1320_s10  ;;  %s85_s29 = int_to_ptr.vmem [resolvable:$true] %s84_s29 }
  0x57   :  { %p1324_p13 = scmp.lt.u32.totalorder %s1320_s10, %s1577_s6 }
  0x59   :  { %p1326_p0 = pnand %p1324_p13, %p1321_p12 }
  0x5b   :  { %1329 = shalt.err (!%p1326_p0)
}
  0x5c   :  { %s1330_s22 = scalar_lea.vmem %s85_s29, 768  ;;  %p1335_p2 = scmp.lt.s32.totalorder %s85_s29, %s85_s29 }
  0x5d   :  { %p1331_p1 = scmp.ne.s32.totalorder %s85_s29, %s1330_s22  ;;  %p1336_p3 = scmp.lt.s32.totalorder %s1330_s22, %s1330_s22 }
  0x5f   :  { %p1337_p4 = por %p1336_p3, %p1335_p2 }
  0x61   :  { %p1338_p5 = pnand %p1337_p4, %p1331_p1 }
  0x63   :  { %1341 = shalt.err (!%p1338_p5)
}
  0x64   :  { %90 = dma.hbm_to_vmem [thread:$0]  %s1577_s6, 768, %s85_s29, [#allocation11], %s1351_s15, %s1351_s15, %s1352_s16  }
  0x65   :  { %1342 = dma.done.wait [#allocation3], 256  }
  0x66   :  { %1343 = vsyncadd [#allocation3], 4294967040 }
  0x67   :  { %1344 = dma.done.wait [#allocation5], 1408  }
  0x68   :  { %1345 = vsyncadd [#allocation5], 4294965888 }
  0x69   :  { %1346 = dma.done.wait [#allocation8], 2304  }
  0x6a   :  { %1347 = vsyncadd [#allocation8], 4294964992 }
  0x6b   :  { %1348 = dma.done.wait [#allocation11], 768  }
  0x6c   :  { %1349 = vsyncadd [#allocation11], 4294966528  ;;  %v1360_v0 = vmov 0.0   ;;  %vm122_vm0 = vcmask 195584   ;;  %v115_v1 = vld [vmem:[#allocation6 + $0x10] sm:$0xff]  ;;  %v118_v2 = vld [vmem:[#allocation6 + $0x28] sm:$0xff] }
  0x6d   :  { %193 = vmatprep.mubr.f32.mxu0 %v1360_v0  ;;  %v1121_v3 = vpack.c.bf16 %v118_v2, %v115_v1  ;;  %v111_v4 = vld [vmem:[#allocation2] sm:$0xff]  ;;  %v284_v6 = vld [vmem:[#allocation7 + $0x8] sm:$0xff]  ;;  %v287_v7 = vld [vmem:[#allocation7 + $0x20] sm:$0xff]  ;;  %vm625_vm1 = vcmask 64512   ;;  %vm757_vm3 = vcmask 392192  }
  0x6e   :  { %v121_v5 = vld [vmem:[#allocation6 + $0x40] sm:$0xff]  ;;  %1054 = vmatprep.mubr.msk.f32.mxu1 %vm122_vm0, %v111_v4  ;;  %v283_v8 = vld [vmem:[#allocation7] sm:$0xff]  ;;  %v1125_v10 = vpack.c.bf16 %v287_v7, %v284_v6  ;;  %v116_v17 = vld [vmem:[#allocation6 + $0x18] sm:$0xff] }
  0x6f   :  { %1122 = vmatprep.subr.bf16.mxu1 %v1121_v3  ;;  %v286_v9 = vld [vmem:[#allocation7 + $0x18] sm:$0xff]  ;;  %v114_v11 = vld [vmem:[#allocation6 + $0x8] sm:$0xff]  ;;  %v285_v20 = vld [vmem:[#allocation7 + $0x10] sm:$0xff] }
  0x70   :  { %1124 = vmatpush3.bf16.msra.mxu1 %v1121_v3  ;;  %v117_v12 = vld [vmem:[#allocation6 + $0x20] sm:$0xff]  ;;  %v112_v13 = vld [vmem:[#allocation2 + $0x8] sm:$0xff]  ;;  %v1127_v14 = vpack.c.bf16 %v286_v9, %v283_v8  ;;  %v288_v21 = vld [vmem:[#allocation7 + $0x28] sm:$0xff] }
  0x71   :  { %1052 = vmatprep.subr.mxu1 %v121_v5  ;;  %v1117_v15 = vpack.c.bf16 %v117_v12, %v114_v11  ;;  %v113_v16 = vld [vmem:[#allocation6] sm:$0xff]  ;;  %v120_v22 = vld [vmem:[#allocation6 + $0x38] sm:$0xff]  ;;  %v1129_v24 = vpack.c.bf16 %v288_v21, %v285_v20  ;;  %v281_v25 = vld [vmem:[#allocation4] sm:$0xff] }
  0x72   :  { %v1119_v18 = vpack.c.bf16 %v116_v17, %v113_v16  ;;  %v290_v19 = vld [vmem:[#allocation7 + $0x38] sm:$0xff]  ;;  %v289_v23 = vld [vmem:[#allocation7 + $0x30] sm:$0xff]  ;;  %v291_v26 = vld [vmem:[#allocation7 + $0x40] sm:$0xff] }
  0x73   :  { %1118 = vmatprep.subr.bf16.mxu0 %v1117_v15  ;;  %v119_v27 = vld [vmem:[#allocation6 + $0x30] sm:$0xff]  ;;  %v282_v28 = vld [vmem:[#allocation4 + $0x8] sm:$0xff]  ;;  %v455_v33 = vld [vmem:[#allocation9 + $0x18] sm:$0xff] }
  0x74   :  { %1053 = vmatpush3.msra.mxu1 %v121_v5  ;;  %1120 = vmatpush1.bf16.msra.mxu0 %v1119_v18  ;;  %v453_v29 = vld [vmem:[#allocation9 + $0x8] sm:$0xff]  ;;  %v456_v30 = vld [vmem:[#allocation9 + $0x20] sm:$0xff]  ;;  %v459_v35 = vld [vmem:[#allocation9 + $0x38] sm:$0xff] }
  0x75   :  { %1055 = vmatmul.mubr.msk.f32.vlgmr.msra.gmra.mrb[0].mxu1 %vm122_vm0, %v112_v13  ;;  %1126 = vmatprep.subr.bf16.mxu1 %v1125_v10  ;;  %v1133_v31 = vpack.c.bf16 %v456_v30, %v453_v29  ;;  %v452_v32 = vld [vmem:[#allocation9] sm:$0xff]  ;;  %v458_v36 = vld [vmem:[#allocation9 + $0x30] sm:$0xff]  ;;  %v451_v38 = vld [vmem:[%s1573_s2 + $0x8] sm:$0xff] }
  0x76   :  { %1128 = vmatpush1.bf16.msra.mxu1 %v1127_v14  ;;  %362 = vmatprep.mubr.f32.mxu1 %v1360_v0  ;;  %v1135_v34 = vpack.c.bf16 %v455_v33, %v452_v32  ;;  %v450_v37 = vld [vmem:[%s1573_s2] sm:$0xff]  ;;  %v457_v40 = vld [vmem:[#allocation9 + $0x28] sm:$0xff]  ;;  %v460_v42 = vld [vmem:[#allocation9 + $0x40] sm:$0xff] }
  0x77   :  { %302 = vmatprep.subr.mxu1 %v290_v19  ;;  %133 = vmatprep.subr.mxu0 %v120_v22  ;;  %v454_v39 = vld [vmem:[#allocation9 + $0x10] sm:$0xff]  ;;  %vm1522_vm2 = vmpackc.low %vm625_vm1, %vm625_vm1  ;;  %v619_v1 = vld [vmem:[#allocation10] sm:$0xff] }
  0x78   :  { %134 = vmatpush1.msra.mxu0 %v119_v27  ;;  %v1137_v41 = vpack.c.bf16 %v457_v40, %v454_v39  ;;  %v620_v3 = vld [vmem:[#allocation10 + $0x8] sm:$0xff]  ;;  %v621_v6 = vld [vmem:[#allocation10 + $0x10] sm:$0xff]  ;;  %v622_v10 = vld [vmem:[#allocation10 + $0x18] sm:$0xff] }
  0x79   :  { %978 = vmatmul.mubr.msk.f32.vlgmr.msra.gmra.mrb[0].mxu0 %vm122_vm0, %v111_v4  ;;  %1134 = vmatprep.subr.bf16.mxu0 %v1133_v31  ;;  %v624_v18 = vld [vmem:[#allocation10 + $0x28] sm:$0xff] }
  0x7a   :  { %303 = vmatpush1.msra.mxu1 %v289_v23  ;;  %199 = vmatprep.mubr.f32.mxu0 %v1360_v0 }
  0x7b   :  { %982 = vmatmul.mubr.msk.f32.vlgmr.msra.gmra.mrb[2].mxu1 %vm122_vm0, %v281_v25  ;;  %1130 = vmatprep.subr.bf16.mxu1 %v1129_v24 }
  0x7c   :  { %368 = vmatprep.mubr.f32.mxu1 %v1360_v0  ;;  %1132 = vmatpush3.bf16.msra.mxu1 %v1129_v24 }
  0x7d   :  { %1061 = vmatprep.subr.mxu1 %v291_v26  ;;  %979 = vmatmul.mubr.msk.f32.gmra.mrb[2].mxu0 %vm122_vm0, %v112_v13  ;;  %v623_v13 = vld [vmem:[#allocation10 + $0x20] sm:$0xff] }
  0x7e   :  { %531 = vmatprep.mubr.f32.mxu0 %v1360_v0  ;;  %1136 = vmatpush1.bf16.msra.mxu0 %v1135_v34 }
  0x7f   :  { %983 = vmatmul.mubr.msk.f32.gmra.mrb[4].mxu1 %vm122_vm0, %v282_v28  ;;  %471 = vmatprep.subr.mxu0 %v459_v35 }
  0x80   :  { %1062 = vmatpush3.msra.mxu1 %v291_v26  ;;  %1063 = vmatprep.mubr.msk.f32.mxu1 %vm122_vm0, %v281_v25 }
  0x81   :  { %1138 = vmatprep.subr.bf16.mxu1 %v1137_v41 }
  0x82   :  { %472 = vmatpush1.msra.mxu0 %v458_v36 }
  0x83   :  { %1064 = vmatmul.mubr.msk.f32.vlgmr.msra.gmra.mrb[6].mxu1 %vm122_vm0, %v282_v28  ;;  %986 = vmatmul.mubr.msk.f32.vlgmr.msra.gmra.mrb[4].mxu0 %vm122_vm0, %v450_v37 }
  0x84   :  { %1072 = vmatprep.mubr.msk.f32.mxu1 %vm122_vm0, %v450_v37  ;;  %537 = vmatprep.mubr.f32.mxu0 %v1360_v0 }
  0x85   :  { %1140 = vmatpush3.bf16.msra.mxu1 %v1137_v41 }
  0x86   :  { %1070 = vmatprep.subr.mxu1 %v460_v42 }
  0x87   :  { %987 = vmatmul.mubr.msk.f32.gmra.mrb[6].mxu0 %vm122_vm0, %v451_v38 }
  0x89   :  { %1071 = vmatpush3.msra.mxu1 %v460_v42 }
  0x8a   :  { %1073 = vmatmul.mubr.msk.f32.vlgmr.msra.gmra.mrb[8].mxu1 %vm122_vm0, %v451_v38 }
 0x148   :  { %v1056_v43 = vpop.f32.mrb[0].mxu1 }
 0x149   :  { %v272_v44 = vpop.f32.mrb[1].mxu1 }
 0x14c   :  { %v195_v47 = vpop.f32.mrb[0].mxu0 }
 0x14d   :  { %v197_v50 = vpop.f32.mrb[1].mxu0  ;;  %1087 = vmatprep.mubr.msk.f32.mxu0 %vm625_vm1, %v195_v47 }
 0x14e   :  { %v364_v45 = vpop.f32.mrb[2].mxu1 }
 0x14f   :  { %v366_v46 = vpop.f32.mrb[3].mxu1 }
 0x150   :  { %v201_v54 = vpop.f32.mrb[2].mxu0 }
 0x151   :  { %v203_v56 = vpop.f32.mrb[3].mxu0 }
 0x152   :  { %v370_v48 = vpop.f32.mrb[4].mxu1 }
 0x153   :  { %v1141_v51 = vpack.c.bf16 %v370_v48, %v364_v45  ;;  %v372_v52 = vpop.f32.mrb[5].mxu1 }
 0x154   :  { %v1147_v53 = vpack.c.bf16 %v372_v52, %v366_v46 }
 0x155   :  { %1143 = vmatprep.subr.msk.bf16.mxu0 %vm1522_vm2, %v1141_v51 }
 0x156   :  { %1146 = vmatpush3.bf16.xpose.msk.msra.mxu0 %vm1522_vm2, %v1141_v51  ;;  %v1065_v55 = vpop.f32.mrb[6].mxu1  ;;  %v533_v59 = vpop.f32.mrb[4].mxu0 }
 0x157   :  { %1149 = vmatprep.subr.msk.bf16.mxu0 %vm1522_vm2, %v1147_v53  ;;  %v441_v57 = vpop.f32.mrb[7].mxu1  ;;  %v535_v60 = vpop.f32.mrb[5].mxu0 }
 0x158   :  { %v1153_v58 = vpack.c.bf16 %v1065_v55, %v441_v57 }
 0x15a   :  { %v539_v61 = vpop.f32.mrb[6].mxu0 }
 0x15b   :  { %v1159_v62 = vpack.c.bf16 %v539_v61, %v533_v59  ;;  %v541_v63 = vpop.f32.mrb[7].mxu0 }
 0x15c   :  { %v1163_v0 = vpack.c.bf16 %v541_v63, %v535_v60 }
 0x15d   :  { %1160 = vmatprep.subr.bf16.mxu1 %v1159_v62  ;;  %v1074_v55 = vpop.f32.mrb[8].mxu1 }
 0x15e   :  { %1152 = vmatpush3.bf16.xpose.msk.msra.mxu0 %vm1522_vm2, %v1147_v53  ;;  %1162 = vmatpush3.bf16.msra.mxu1 %v1159_v62 }
 0x15f   :  { %1155 = vmatprep.subr.msk.bf16.mxu0 %vm1522_vm2, %v1153_v58  ;;  %1164 = vmatprep.subr.bf16.mxu1 %v1163_v0 }
 0x162   :  { %1166 = vmatpush3.bf16.msra.mxu1 %v1163_v0 }
 0x166   :  { %1158 = vmatpush3.bf16.xpose.msk.msra.mxu0 %vm1522_vm2, %v1153_v58 }
 0x16d   :  { %1088 = vmatmul.mubr.msk.f32.vlgmr.msra.gmra.mrb[8].mxu0 %vm625_vm1, %v201_v54 }
 0x16e   :  { %1090 = vmatprep.mubr.msk.f32.mxu0 %vm625_vm1, %v197_v50 }
 0x171   :  { %1091 = vmatmul.mubr.msk.f32.gmra.mrb[10].mxu0 %vm625_vm1, %v203_v56  ;;  %v610_v56 = vpop.f32.mrb[9].mxu1 }
 0x172   :  { %1093 = vmatprep.mubr.msk.f32.mxu0 %vm625_vm1, %v272_v44  ;;  %v1167_v57 = vpack.c.bf16 %v1074_v55, %v610_v56 }
 0x174   :  { %1168 = vmatprep.subr.bf16.mxu1 %v1167_v57 }
 0x175   :  { %1094 = vmatmul.mubr.msk.f32.gmra.mrb[12].mxu0 %vm625_vm1, %v1056_v43  ;;  %1170 = vmatpush3.bf16.msra.mxu1 %v1167_v57 }
 0x240   :  { %v1089_v2 = vpop.f32.mrb[8].mxu0 }
 0x241   :  { %v728_v4 = vpop.f32.mrb[9].mxu0  ;;  %v734_v7 = vadd.f32 %v1089_v2, %v620_v3 }
 0x242   :  { %v729_v5 = vadd.f32 %v728_v4, %v619_v1 }
 0x243   :  { %v761_v17 = vsel %vm757_vm3, %v734_v7, -inf }
 0x244   :  { %v1092_v8 = vpop.f32.mrb[10].mxu0  ;;  %v758_v9 = vsel %vm757_vm3, %v729_v5, -inf }
 0x245   :  { %v738_v11 = vpop.f32.mrb[11].mxu0  ;;  %759 = vmax.xlane.f32.xlu0 %v758_v9  ;;  %v744_v14 = vadd.f32 %v1092_v8, %v622_v10 }
 0x246   :  { %v739_v12 = vadd.f32 %v738_v11, %v621_v6 }
 0x247   :  { %v767_v22 = vsel %vm757_vm3, %v744_v14, -inf }
 0x248   :  { %v1095_v15 = vpop.f32.mrb[12].mxu0  ;;  %v764_v16 = vsel %vm757_vm3, %v739_v12, -inf }
 0x249   :  { %v748_v19 = vpop.f32.mrb[13].mxu0  ;;  %765 = vmax.xlane.f32.xlu1 %v764_v16  ;;  %762 = vmax.xlane.f32.xlu0 %v761_v17  ;;  %v754_v21 = vadd.f32 %v1095_v15, %v624_v18 }
 0x24a   :  { %v749_v20 = vadd.f32 %v748_v19, %v623_v13 }
 0x24b   :  { %v773_v24 = vsel %vm757_vm3, %v754_v21, -inf }
 0x24c   :  { %v770_v23 = vsel %vm757_vm3, %v749_v20, -inf }
 0x24d   :  { %768 = vmax.xlane.f32.xlu1 %v767_v22  ;;  %771 = vmax.xlane.f32.xlu0 %v770_v23 }
 0x251   :  { %774 = vmax.xlane.f32.xlu1 %v773_v24 }
 0x2d2   :  { %v760_v25 = vpop.xlane.xlu0 %759 }
 0x2d3   :  { %v776_v26 = vsub.f32 %v729_v5, %v760_v25 }
 0x2d5   :  { %v782_v27 = vmul.f32 1.442695, %v776_v26 }
 0x2d6   :  { %v766_v28 = vpop.xlane.xlu1 %765  ;;  %v763_v29 = vpop.xlane.xlu0 %762 }
 0x2d7   :  { %1186 = vpow2.f32 %v782_v27  ;;  %v778_v30 = vsub.f32 %v739_v12, %v766_v28  ;;  %v777_v31 = vsub.f32 %v734_v7, %v763_v29 }
 0x2d9   :  { %v786_v32 = vmul.f32 1.442695, %v778_v30  ;;  %v784_v33 = vmul.f32 1.442695, %v777_v31  ;;  %v1008_v30 = vld [vmem:[%s1578_s7] ss:$0 sm:$0xff] }
 0x2da   :  { %v769_v34 = vpop.xlane.xlu1 %768  ;;  %v772_v35 = vpop.xlane.xlu0 %771 }
 0x2db   :  { %1188 = vpow2.f32 %v786_v32  ;;  %v779_v36 = vsub.f32 %v744_v14, %v769_v34  ;;  %v780_v37 = vsub.f32 %v749_v20, %v772_v35 }
 0x2dc   :  { %1190 = vpow2.f32 %v784_v33 }
 0x2dd   :  { %v788_v38 = vmul.f32 1.442695, %v779_v36  ;;  %v790_v39 = vmul.f32 1.442695, %v780_v37 }
 0x2de   :  { %v775_v40 = vpop.xlane.xlu1 %774 }
 0x2df   :  { %1192 = vpow2.f32 %v788_v38  ;;  %v781_v41 = vsub.f32 %v754_v21, %v775_v40 }
 0x2e0   :  { %1194 = vpow2.f32 %v790_v39 }
 0x2e1   :  { %v1187_v42 = vpop.eup %1186  ;;  %v792_v43 = vmul.f32 1.442695, %v781_v41 }
 0x2e2   :  { %v794_v44 = vsel %vm757_vm3, %v1187_v42, 0.0 }
 0x2e3   :  { %1196 = vpow2.f32 %v792_v43  ;;  %795 = vadd.xlane.f32.xlu0 %v794_v44 }
 0x2e5   :  { %v1189_v45 = vpop.eup %1188 }
 0x2e6   :  { %v1191_v46 = vpop.eup %1190  ;;  %v800_v47 = vsel %vm757_vm3, %v1189_v45, 0.0 }
 0x2e7   :  { %801 = vadd.xlane.f32.xlu0 %v800_v47  ;;  %v797_v48 = vsel %vm757_vm3, %v1191_v46, 0.0 }
 0x2e8   :  { %798 = vadd.xlane.f32.xlu1 %v797_v48 }
 0x2e9   :  { %v1193_v49 = vpop.eup %1192 }
 0x2ea   :  { %v1195_v50 = vpop.eup %1194  ;;  %v803_v51 = vsel %vm757_vm3, %v1193_v49, 0.0 }
 0x2eb   :  { %v806_v52 = vsel %vm757_vm3, %v1195_v50, 0.0 }
 0x2ec   :  { %804 = vadd.xlane.f32.xlu1 %v803_v51  ;;  %807 = vadd.xlane.f32.xlu0 %v806_v52 }
 0x2ed   :  { %v1197_v53 = vpop.eup %1196 }
 0x2ee   :  { %v809_v54 = vsel %vm757_vm3, %v1197_v53, 0.0 }
 0x2f0   :  { %810 = vadd.xlane.f32.xlu1 %v809_v54 }
 0x370   :  { %v796_v58 = vpop.xlane.xlu0 %795 }
 0x371   :  { %1198 = vrcp.f32 %v796_v58 }
 0x374   :  { %v802_v59 = vpop.xlane.xlu0 %801 }
 0x375   :  { %v799_v60 = vpop.xlane.xlu1 %798  ;;  %1200 = vrcp.f32 %v802_v59 }
 0x376   :  { %1202 = vrcp.f32 %v799_v60 }
 0x379   :  { %v805_v61 = vpop.xlane.xlu1 %804  ;;  %v808_v62 = vpop.xlane.xlu0 %807 }
 0x37a   :  { %1204 = vrcp.f32 %v805_v61 }
 0x37b   :  { %v1199_v63 = vpop.eup %1198  ;;  %1206 = vrcp.f32 %v808_v62 }
 0x37c   :  { %v818_v0 = vmul.f32 %v1199_v63, %v796_v58 }
 0x37d   :  { %v811_v1 = vpop.xlane.xlu1 %810 }
 0x37e   :  { %v824_v2 = vsub.f32 2.0, %v818_v0  ;;  %1208 = vrcp.f32 %v811_v1 }
 0x37f   :  { %v1201_v3 = vpop.eup %1200 }
 0x380   :  { %v1203_v4 = vpop.eup %1202  ;;  %v830_v5 = vmul.f32 %v1199_v63, %v824_v2  ;;  %v820_v6 = vmul.f32 %v1201_v3, %v802_v59 }
 0x381   :  { %v819_v7 = vmul.f32 %v1203_v4, %v799_v60 }
 0x382   :  { %v836_v8 = vmul.f32 %v1187_v42, %v830_v5  ;;  %v826_v9 = vsub.f32 2.0, %v820_v6 }
 0x383   :  { %v825_v10 = vsub.f32 2.0, %v819_v7 }
 0x384   :  { %v1205_v11 = vpop.eup %1204  ;;  %v832_v12 = vmul.f32 %v1201_v3, %v826_v9  ;;  %1108 = vmatprep.mubr.msk.f32.mxu1 %vm757_vm3, %v836_v8 }
 0x385   :  { %v1207_v13 = vpop.eup %1206  ;;  %v831_v14 = vmul.f32 %v1203_v4, %v825_v10  ;;  %v821_v15 = vmul.f32 %v1205_v11, %v805_v61 }
 0x386   :  { %v838_v16 = vmul.f32 %v1189_v45, %v832_v12  ;;  %v822_v17 = vmul.f32 %v1207_v13, %v808_v62 }
 0x387   :  { %v837_v18 = vmul.f32 %v1191_v46, %v831_v14  ;;  %v827_v19 = vsub.f32 2.0, %v821_v15 }
 0x388   :  { %v1209_v20 = vpop.eup %1208  ;;  %v828_v21 = vsub.f32 2.0, %v822_v17 }
 0x389   :  { %1109 = vmatmul.mubr.msk.f32.vlgmr.msra.gmra.mrb[10].mxu1 %vm757_vm3, %v837_v18  ;;  %v833_v22 = vmul.f32 %v1205_v11, %v827_v19  ;;  %v823_v23 = vmul.f32 %v1209_v20, %v811_v1 }
 0x38a   :  { %1111 = vmatprep.mubr.msk.f32.mxu1 %vm757_vm3, %v838_v16  ;;  %v834_v24 = vmul.f32 %v1207_v13, %v828_v21 }
 0x38b   :  { %v839_v25 = vmul.f32 %v1193_v49, %v833_v22  ;;  %v829_v26 = vsub.f32 2.0, %v823_v23 }
 0x38c   :  { %v840_v27 = vmul.f32 %v1195_v50, %v834_v24 }
 0x38d   :  { %v835_v28 = vmul.f32 %v1209_v20, %v829_v26 }
 0x38f   :  { %v841_v29 = vmul.f32 %v1197_v53, %v835_v28 }
 0x391   :  { %1112 = vmatmul.mubr.msk.f32.gmra.mrb[10].mxu1 %vm757_vm3, %v839_v25 }
 0x392   :  { %1114 = vmatprep.mubr.msk.f32.mxu1 %vm757_vm3, %v840_v27 }
 0x399   :  { %1115 = vmatmul.mubr.msk.f32.gmra.mrb[10].mxu1 %vm757_vm3, %v841_v29 }
 0x46c   :  { %v1116_v31 = vpop.f32.mrb[10].mxu1 }
 0x46d   :  { %v967_v32 = vadd.f32 %v1116_v31, %v1008_v30  ;;  %v946_v33 = vpop.f32.mrb[11].mxu1 }
 0x46e   :  { %v966_v34 = vadd.f32 %v1008_v30, %v946_v33 }
 0x46f   :  { %969 = vst [vmem:[%s1579_s8 + $0x8] sm:$0xff] %v967_v32 }
 0x470   :  { %968 = vst [vmem:[%s1579_s8] sm:$0xff] %v966_v34 }
 0x471   :  { %974 = vsyncpa [#allocation3], 1 }
 0x472   :  { %975 = vsyncpa [#allocation5], 1 }
 0x473   :  { %976 = vsyncpa [#allocation8], 1 }
 0x474   :  { %977 = vsyncpa [#allocation11], 1 }

</bundles_post_ra>
